<compile_context>
chip_gen: v5e
topology: v5e:2x2
jax: 0.10.0
libtpu: 0.0.40
codegen_flags: <defaults>
</compile_context>

<pallas_src>
import jax
import jax.numpy as jnp
from jax.experimental import pallas as pl
from jax.experimental.pallas import tpu as pltpu


def _choose_c_block(C, per_c_bytes, budget=40 << 20):
    """Largest lane-aligned channel block whose pipelined VMEM footprint fits
    `budget` (sized with headroom under v7x's 64 MiB per-core VMEM)."""
    if C <= 128 or C * per_c_bytes <= budget:
        return C
    cb = max(128, (budget // per_c_bytes) // 128 * 128)
    return int(cb)


def spatial_max_pool(x, kernel_size, stride=None, padding=0):
    """Equivalent of SpatialMaxPool.forward for NCHW inputs."""
    if stride is None:
        stride = kernel_size
    K, S, P = int(kernel_size), int(stride), int(padding)

    N, C, H, W = x.shape
    Hp, Wp = H + 2 * P, W + 2 * P
    Ho = (Hp - K) // S + 1
    Wo = (Wp - K) // S + 1
    dtype = x.dtype

    if jnp.issubdtype(dtype, jnp.floating):
        fill = float("-inf")
    else:
        fill = int(jnp.iinfo(dtype).min)

    # ---- layout plumbing: NCHW -> NHWC so C maps onto the 128-wide lane axis.
    xt = jnp.transpose(x, (0, 2, 3, 1))  # (N, H, W, C)

    # ---- channel tiling sized to VMEM (double-buffered in/out + scratch).
    itemsize = jnp.dtype(dtype).itemsize
    per_c = itemsize * (2 * H * W + 2 * Ho * Wo + Hp * Wo + (Hp * Wp if P else 0))
    cb = _choose_c_block(C, per_c)
    grid = (N, pl.cdiv(C, cb))
    needed = per_c * cb
    vmem_limit = int(min(48 << 20, max(16 << 20, 2 * needed + (1 << 20))))

    scratch = [pltpu.VMEM((1, Hp, Wo, cb), dtype)]          # row-max buffer
    if P > 0:
        scratch.append(pltpu.VMEM((1, Hp, Wp, cb), dtype))  # in-VMEM padded tile

    def _ds(start, size):
        # Strided window taps; stride only ever applied on sublane/outer dims.
        return pl.ds(start, size) if S == 1 else pl.ds(start, size, S)

    def kernel(x_ref, o_ref, row_ref, *pad_scratch):
        # x_ref:   (1, H,  W,  Cb)   NHWC input tile (lanes = channels)
        # o_ref:   (1, Ho, Wo, Cb)   pooled output tile
        # row_ref: (1, Hp, Wo, Cb)   column-max buffer
        if P > 0:
            pad_ref = pad_scratch[0]               # (1, Hp, Wp, Cb)
            pad_ref[...] = jnp.full(pad_ref.shape, fill, dtype)
            pad_ref[:, P:P + H, P:P + W, :] = x_ref[...]
            src = pad_ref
        else:
            src = x_ref

        # Pass 1: running max over the K column taps (kw). Stride lives on the
        # sublane (W) axis -> plain sublane-strided vld + vmax per tap.
        rb = src[:, :, _ds(0, Wo), :]
        for kw in range(1, K):
            rb = jnp.maximum(rb, src[:, :, _ds(kw, Wo), :])
        row_ref[...] = rb

        # Pass 2: running max over the K row taps (kh). Stride on the outer H
        # axis -> selects whole (sublane x lane) tiles, no relayout.
        acc = row_ref[:, _ds(0, Ho), :, :]
        for kh in range(1, K):
            acc = jnp.maximum(acc, row_ref[:, _ds(kh, Ho), :, :])
        o_ref[...] = acc

    pooled = pl.pallas_call(
        kernel,
        out_shape=jax.ShapeDtypeStruct((N, Ho, Wo, C), dtype),
        grid=grid,
        in_specs=[pl.BlockSpec((1, H, W, cb), lambda n, c: (n, 0, 0, c))],
        out_specs=pl.BlockSpec((1, Ho, Wo, cb), lambda n, c: (n, 0, 0, c)),
        scratch_shapes=scratch,
        compiler_params=pltpu.CompilerParams(
            dimension_semantics=("parallel", "parallel"),
            vmem_limit_bytes=vmem_limit,
        ),
    )(xt)

    # NHWC pooled -> NCHW flatten order to match torch's x.view(N, -1, 1, 1).
    return jnp.transpose(pooled, (0, 3, 1, 2)).reshape(N, C * Ho * Wo, 1, 1)


def _reference(x, kernel_size, stride=None, padding=0):
    """Pure-JAX reference (same semantics) for correctness checking."""
    if stride is None:
        stride = kernel_size
    N, C, H, W = x.shape
    if padding:
        x = jnp.pad(
            x,
            ((0, 0), (0, 0), (padding, padding), (padding, padding)),
            constant_values=-jnp.inf,
        )
    Hp, Wp = H + 2 * padding, W + 2 * padding
    Ho = (Hp - kernel_size) // stride + 1
    Wo = (Wp - kernel_size) // stride + 1
    acc = jnp.full((N, C, Ho, Wo), -jnp.inf, dtype=x.dtype)
    for kh in range(kernel_size):
        for kw in range(kernel_size):
            win = x[:, :, kh:kh + stride * Ho:stride, kw:kw + stride * Wo:stride]
            acc = jnp.maximum(acc, win)
    return acc.reshape(N, -1, 1, 1)


if __name__ == "__main__":
    key = jax.random.PRNGKey(0)
    x = jax.random.normal(key, (2, 4, 16, 16), dtype=jnp.float32)  # NCHW

    # Module config under test: MaxPool2d(2) -> stride=2, padding=0.
    out = spatial_max_pool(x, kernel_size=2)
    out = jax.block_until_ready(out)
    ref = _reference(x, kernel_size=2)
    assert out.shape == (2, 4 * 8 * 8, 1, 1), out.shape
    assert jnp.allclose(out, ref), "mismatch vs reference (k=2, s=2, p=0)"

    # Overlapping + padded config exercises the in-VMEM padding path and the
    # sublane/outer-dim strided taps (no lane-strided loads anywhere).
    out2 = jax.block_until_ready(spatial_max_pool(x, kernel_size=3, stride=2, padding=1))
    ref2 = _reference(x, kernel_size=3, stride=2, padding=1)
    assert out2.shape == ref2.shape, (out2.shape, ref2.shape)
    assert jnp.allclose(out2, ref2), "mismatch vs reference (k=3, s=2, p=1)"

    print("KERNEL_OK")
</pallas_src>

<mosaic_0001>
module attributes {stable_mosaic.version = 11 : i64} {
  func.func @kernel(%arg0: i32, %arg1: i32, %arg2: memref<1x16x16x4xf32, #tpu.memory_space<vmem>>, %arg3: memref<1x8x8x4xf32, #tpu.memory_space<vmem>>, %arg4: memref<1x16x8x4xf32, #tpu.memory_space<vmem>>) attributes {dimension_semantics = [#tpu.dimension_semantics<parallel>, #tpu.dimension_semantics<parallel>], iteration_bounds = array<i64: 2, 1>, scalar_prefetch = 0 : i64, scratch_operands = 1 : i64, tpu.core_type = #tpu.core_type<tc>, window_params = [{transform_indices = @transform_0, window_bounds = array<i64: 1, 16, 16, 4>}, {transform_indices = @transform_1, window_bounds = array<i64: 1, 8, 8, 4>}]} {
    %c0 = arith.constant 0 : index
    %c0_0 = arith.constant 0 : index
    %c0_1 = arith.constant 0 : index
    %c0_2 = arith.constant 0 : index
    %0 = tpu.strided_load %arg2[%c0, %c0_0, %c0_1, %c0_2] {strides = array<i32: 1, 1, 2, 1>} : memref<1x16x16x4xf32, #tpu.memory_space<vmem>>, vector<1x16x8x4xf32>
    %c0_3 = arith.constant 0 : index
    %c0_4 = arith.constant 0 : index
    %c1 = arith.constant 1 : index
    %c0_5 = arith.constant 0 : index
    %1 = tpu.strided_load %arg2[%c0_3, %c0_4, %c1, %c0_5] {strides = array<i32: 1, 1, 2, 1>} : memref<1x16x16x4xf32, #tpu.memory_space<vmem>>, vector<1x16x8x4xf32>
    %2 = arith.maximumf %0, %1 : vector<1x16x8x4xf32>
    %c0_6 = arith.constant 0 : index
    %c0_7 = arith.constant 0 : index
    %c0_8 = arith.constant 0 : index
    %c0_9 = arith.constant 0 : index
    %3 = vector.load %arg4[%c0_6, %c0_7, %c0_8, %c0_9] : memref<1x16x8x4xf32, #tpu.memory_space<vmem>>, vector<1x16x8x4xf32>
    tpu.vector_store %arg4[%c0_6, %c0_7, %c0_8, %c0_9], %2 {strides = array<i32>} : memref<1x16x8x4xf32, #tpu.memory_space<vmem>>, vector<1x16x8x4xf32>,
    %c0_10 = arith.constant 0 : index
    %c0_11 = arith.constant 0 : index
    %c0_12 = arith.constant 0 : index
    %c0_13 = arith.constant 0 : index
    %4 = tpu.strided_load %arg4[%c0_10, %c0_11, %c0_12, %c0_13] {strides = array<i32: 1, 2, 1, 1>} : memref<1x16x8x4xf32, #tpu.memory_space<vmem>>, vector<1x8x8x4xf32>
    %c0_14 = arith.constant 0 : index
    %c1_15 = arith.constant 1 : index
    %c0_16 = arith.constant 0 : index
    %c0_17 = arith.constant 0 : index
    %5 = tpu.strided_load %arg4[%c0_14, %c1_15, %c0_16, %c0_17] {strides = array<i32: 1, 2, 1, 1>} : memref<1x16x8x4xf32, #tpu.memory_space<vmem>>, vector<1x8x8x4xf32>
    %6 = arith.maximumf %4, %5 : vector<1x8x8x4xf32>
    %c0_18 = arith.constant 0 : index
    %c0_19 = arith.constant 0 : index
    %c0_20 = arith.constant 0 : index
    %c0_21 = arith.constant 0 : index
    %7 = vector.load %arg3[%c0_18, %c0_19, %c0_20, %c0_21] : memref<1x8x8x4xf32, #tpu.memory_space<vmem>>, vector<1x8x8x4xf32>
    tpu.vector_store %arg3[%c0_18, %c0_19, %c0_20, %c0_21], %6 {strides = array<i32>} : memref<1x8x8x4xf32, #tpu.memory_space<vmem>>, vector<1x8x8x4xf32>,
    return
  }
  func.func @transform_0(%arg0: i32, %arg1: i32) -> (i32, i32, i32, i32) {
    %c0_i32 = arith.constant 0 : i32
    %c0_i32_0 = arith.constant 0 : i32
    %c0_i32_1 = arith.constant 0 : i32
    return %arg0, %c0_i32, %c0_i32_0, %arg1 : i32, i32, i32, i32
  }
  func.func @transform_1(%arg0: i32, %arg1: i32) -> (i32, i32, i32, i32) {
    %c0_i32 = arith.constant 0 : i32
    %c0_i32_0 = arith.constant 0 : i32
    %c0_i32_1 = arith.constant 0 : i32
    return %arg0, %c0_i32, %c0_i32_0, %arg1 : i32, i32, i32, i32
  }
}

</mosaic_0001>

<bundles_post_ra>
// kernel: tpu_custom_call.1
= control target key start
LH: loop header
LB: loop body
LE: loop exit
PB: predicated region body
PF: predicated region fallthrough
CT: control target
= control target key end

     0   :  { %s462_s6 = smov 0   ;;  %s464_s7 = smov 0   ;;  %s559_s0 = inlined_call_operand.vmem [shape: f32[2,16,16,4], index: 0, kind: input, shape index: {}]   ;;  %s560_s1 = inlined_call_operand.vmem [shape: f32[2,8,8,4], index: 1, kind: output, shape index: {}]  }
   0x1   :  { %s466_s8 = smov 0  }
   0x2 LB: > { %s23_s9 = sadd.s32 1, %s446_s7  ;;  %p364_p0 = scmp.ge.s32.totalorder %s450_s8, 1  ;;  %s450_s8 = sphi %s466_s8, %s11_s8   ;;  %s446_s7 = sphi %s464_s7, %s562_s7   ;;  %s442_s6 = sphi %s462_s6, %s561_s6  }
   0x3   : > { %p25_p1 = scmp.ge.s32.totalorder %s23_s9, 2  ;;  %p106_p2 = scmp.lt.s32.totalorder %s450_s8, 3 }
   0x5   : > { %s564_s9 = smov (%p25_p1, %s23_s9), 0  ;;  %p107_p3 = pnand %p364_p0, %p106_p2 }
   0x6   : > { %p132_p4 = scmp.lt.s32.totalorder (!%p107_p3), %s442_s6, 1 }
   0x7   : > { %110 = sbr.rel (%p107_p3) target bundleno = 44 (0x2c), region = 24 }
   0xc   : > { %s566_s6 = smov (!%p132_p4, %s442_s6), 1  ;;  %vm227_vm0 = vcmask 31744  }
   0xd   : > { %s402_s10 = sshll.u32 %s566_s6, 8  ;;  %s403_s14 = sshll.u32 %s566_s6, 6 }
   0xe   : > { %s486_s13 = scalar_lea.vmem %s559_s0, %s402_s10  ;;  %s147_s17 = scalar_lea.vmem %s560_s1, %s403_s14 }
   0xf   : > { %v148_v0 = vld [vmem:[%s486_s13] ss:$2 sm:$0xff]  ;;  %v384_v1 = vld [vmem:[%s486_s13 + $0x1] ss:$2 sm:$0xff]  ;;  %v369_v2 = vld [vmem:[%s486_s13 + $0x10] ss:$2 sm:$0xff] }
  0x10   : > { %v211_v3 = vmax.f32 %v148_v0, %v384_v1  ;;  %v385_v4 = vld [vmem:[%s486_s13 + $0x11] ss:$2 sm:$0xff]  ;;  %v370_v5 = vld [vmem:[%s486_s13 + $0x20] ss:$2 sm:$0xff]  ;;  %v386_v6 = vld [vmem:[%s486_s13 + $0x21] ss:$2 sm:$0xff] }
  0x11   : > { %v212_v7 = vmax.f32 %v369_v2, %v385_v4  ;;  %v213_v8 = vmax.f32 %v370_v5, %v386_v6  ;;  %v371_v9 = vld [vmem:[%s486_s13 + $0x30] ss:$2 sm:$0xff]  ;;  %v387_v10 = vld [vmem:[%s486_s13 + $0x31] ss:$2 sm:$0xff]  ;;  %v372_v11 = vld [vmem:[%s486_s13 + $0x40] ss:$2 sm:$0xff] }
  0x12   : > { %228 = vst.msk [vmem:[#allocation2] sm:$0xff] %vm227_vm0, %v211_v3  ;;  %v214_v12 = vmax.f32 %v371_v9, %v387_v10  ;;  %v388_v13 = vld [vmem:[%s486_s13 + $0x41] ss:$2 sm:$0xff]  ;;  %v373_v14 = vld [vmem:[%s486_s13 + $0x50] ss:$2 sm:$0xff] }
  0x13   : > { %229 = vst.msk [vmem:[#allocation2 + $0x8] sm:$0xff] %vm227_vm0, %v212_v7  ;;  %v215_v15 = vmax.f32 %v372_v11, %v388_v13  ;;  %v389_v16 = vld [vmem:[%s486_s13 + $0x51] ss:$2 sm:$0xff]  ;;  %v374_v17 = vld [vmem:[%s486_s13 + $0x60] ss:$2 sm:$0xff] }
  0x14   : > { %230 = vst.msk [vmem:[#allocation2 + $0x10] sm:$0xff] %vm227_vm0, %v213_v8  ;;  %v216_v18 = vmax.f32 %v373_v14, %v389_v16  ;;  %v390_v19 = vld [vmem:[%s486_s13 + $0x61] ss:$2 sm:$0xff]  ;;  %v375_v20 = vld [vmem:[%s486_s13 + $0x70] ss:$2 sm:$0xff] }
  0x15   : > { %231 = vst.msk [vmem:[#allocation2 + $0x18] sm:$0xff] %vm227_vm0, %v214_v12  ;;  %v217_v21 = vmax.f32 %v374_v17, %v390_v19  ;;  %v391_v22 = vld [vmem:[%s486_s13 + $0x71] ss:$2 sm:$0xff]  ;;  %v376_v23 = vld [vmem:[%s486_s13 + $0x80] ss:$2 sm:$0xff] }
  0x16   : > { %232 = vst.msk [vmem:[#allocation2 + $0x20] sm:$0xff] %vm227_vm0, %v215_v15  ;;  %v218_v24 = vmax.f32 %v375_v20, %v391_v22  ;;  %v392_v25 = vld [vmem:[%s486_s13 + $0x81] ss:$2 sm:$0xff]  ;;  %v377_v26 = vld [vmem:[%s486_s13 + $0x90] ss:$2 sm:$0xff] }
  0x17   : > { %233 = vst.msk [vmem:[#allocation2 + $0x28] sm:$0xff] %vm227_vm0, %v216_v18  ;;  %v219_v27 = vmax.f32 %v376_v23, %v392_v25  ;;  %v393_v28 = vld [vmem:[%s486_s13 + $0x91] ss:$2 sm:$0xff]  ;;  %v378_v29 = vld [vmem:[%s486_s13 + $0xa0] ss:$2 sm:$0xff] }
  0x18   : > { %234 = vst.msk [vmem:[#allocation2 + $0x30] sm:$0xff] %vm227_vm0, %v217_v21  ;;  %v220_v30 = vmax.f32 %v377_v26, %v393_v28  ;;  %v394_v31 = vld [vmem:[%s486_s13 + $0xa1] ss:$2 sm:$0xff]  ;;  %v379_v32 = vld [vmem:[%s486_s13 + $0xb0] ss:$2 sm:$0xff] }
  0x19   : > { %235 = vst.msk [vmem:[#allocation2 + $0x38] sm:$0xff] %vm227_vm0, %v218_v24  ;;  %v221_v33 = vmax.f32 %v378_v29, %v394_v31  ;;  %v395_v34 = vld [vmem:[%s486_s13 + $0xb1] ss:$2 sm:$0xff]  ;;  %v380_v35 = vld [vmem:[%s486_s13 + $0xc0] ss:$2 sm:$0xff] }
  0x1a   : > { %v244_v36 = vld [vmem:[#allocation2] sm:$0xff]  ;;  %236 = vst.msk [vmem:[#allocation2 + $0x40] sm:$0xff] %vm227_vm0, %v219_v27  ;;  %v222_v37 = vmax.f32 %v379_v32, %v395_v34  ;;  %v381_v39 = vld [vmem:[%s486_s13 + $0xd0] ss:$2 sm:$0xff]  ;;  %v253_v40 = vld [vmem:[#allocation2 + $0x8] sm:$0xff] }
  0x1b   : > { %v396_v38 = vld [vmem:[%s486_s13 + $0xc1] ss:$2 sm:$0xff]  ;;  %237 = vst.msk [vmem:[#allocation2 + $0x48] sm:$0xff] %vm227_vm0, %v220_v30  ;;  %v397_v42 = vld [vmem:[%s486_s13 + $0xd1] ss:$2 sm:$0xff]  ;;  %v261_v53 = vmax.f32 %v244_v36, %v253_v40 }
  0x1c   : > { %v223_v41 = vmax.f32 %v380_v35, %v396_v38  ;;  %v382_v43 = vld [vmem:[%s486_s13 + $0xe0] ss:$2 sm:$0xff]  ;;  %v245_v44 = vld [vmem:[#allocation2 + $0x10] sm:$0xff]  ;;  %238 = vst.msk [vmem:[#allocation2 + $0x50] sm:$0xff] %vm227_vm0, %v221_v33  ;;  %v224_v45 = vmax.f32 %v381_v39, %v397_v42  ;;  %v398_v46 = vld [vmem:[%s486_s13 + $0xe1] ss:$2 sm:$0xff] }
  0x1d   : > { %v383_v47 = vld [vmem:[%s486_s13 + $0xf0] ss:$2 sm:$0xff]  ;;  %239 = vst.msk [vmem:[#allocation2 + $0x58] sm:$0xff] %vm227_vm0, %v222_v37  ;;  %v225_v49 = vmax.f32 %v382_v43, %v398_v46  ;;  %v399_v50 = vld [vmem:[%s486_s13 + $0xf1] ss:$2 sm:$0xff]  ;;  %v246_v51 = vld [vmem:[#allocation2 + $0x20] sm:$0xff] }
  0x1e   : > { %v254_v48 = vld [vmem:[#allocation2 + $0x18] sm:$0xff]  ;;  %240 = vst.msk [vmem:[#allocation2 + $0x60] sm:$0xff] %vm227_vm0, %v223_v41  ;;  %v226_v52 = vmax.f32 %v383_v47, %v399_v50  ;;  %v255_v54 = vld [vmem:[#allocation2 + $0x28] sm:$0xff] }
  0x1f   : > { %241 = vst.msk [vmem:[#allocation2 + $0x68] sm:$0xff] %vm227_vm0, %v224_v45  ;;  %v262_v55 = vmax.f32 %v245_v44, %v254_v48  ;;  %v247_v56 = vld [vmem:[#allocation2 + $0x30] sm:$0xff]  ;;  %v263_v57 = vmax.f32 %v246_v51, %v255_v54 }
  0x20   : > { %242 = vst.msk [vmem:[#allocation2 + $0x70] sm:$0xff] %vm227_vm0, %v225_v49  ;;  %v256_v58 = vld [vmem:[#allocation2 + $0x38] sm:$0xff] }
  0x21   : > { %243 = vst.msk [vmem:[#allocation2 + $0x78] sm:$0xff] %vm227_vm0, %v226_v52  ;;  %v264_v59 = vmax.f32 %v247_v56, %v256_v58  ;;  %v248_v60 = vld [vmem:[#allocation2 + $0x40] sm:$0xff] }
  0x22   : > { %269 = vst.msk [vmem:[%s147_s17] sm:$0xff] %vm227_vm0, %v261_v53  ;;  %v257_v61 = vld [vmem:[#allocation2 + $0x48] sm:$0xff] }
  0x23   : > { %270 = vst.msk [vmem:[%s147_s17 + $0x8] sm:$0xff] %vm227_vm0, %v262_v55  ;;  %v265_v62 = vmax.f32 %v248_v60, %v257_v61  ;;  %v249_v63 = vld [vmem:[#allocation2 + $0x50] sm:$0xff] }
  0x24   : > { %271 = vst.msk [vmem:[%s147_s17 + $0x10] sm:$0xff] %vm227_vm0, %v263_v57  ;;  %v258_v0 = vld [vmem:[#allocation2 + $0x58] sm:$0xff] }
  0x25   : > { %272 = vst.msk [vmem:[%s147_s17 + $0x18] sm:$0xff] %vm227_vm0, %v264_v59  ;;  %v266_v1 = vmax.f32 %v249_v63, %v258_v0  ;;  %v250_v2 = vld [vmem:[#allocation2 + $0x60] sm:$0xff] }
  0x26   : > { %273 = vst.msk [vmem:[%s147_s17 + $0x20] sm:$0xff] %vm227_vm0, %v265_v62  ;;  %v259_v3 = vld [vmem:[#allocation2 + $0x68] sm:$0xff] }
  0x27   : > { %274 = vst.msk [vmem:[%s147_s17 + $0x28] sm:$0xff] %vm227_vm0, %v266_v1  ;;  %v267_v4 = vmax.f32 %v250_v2, %v259_v3  ;;  %v251_v5 = vld [vmem:[#allocation2 + $0x70] sm:$0xff] }
  0x28   : > { %v260_v6 = vld [vmem:[#allocation2 + $0x78] sm:$0xff] }
  0x29   : > { %275 = vst.msk [vmem:[%s147_s17 + $0x30] sm:$0xff] %vm227_vm0, %v267_v4  ;;  %v268_v7 = vmax.f32 %v251_v5, %v260_v6 }
  0x2b   : > { %276 = vst.msk [vmem:[%s147_s17 + $0x38] sm:$0xff] %vm227_vm0, %v268_v7 }
  0x2c PF: > { %s11_s8 = sadd.s32 1, %s450_s8   ;;  %s561_s6 = smov %s446_s7 }
  0x2d   : > { %p8_p5 = scmp.ge.s32.totalorder %s11_s8, 4   ;;  %s562_s7 = smov %s564_s9 }
  0x2f   :  { %10 = sbr.rel (!%p8_p5) target bundleno = 2 (0x2), region = 86 }

</bundles_post_ra>
